<compile_context>
chip_gen: v7x
topology: tpu7x:2x2x1
jax: 0.10.0
libtpu: 0.0.40
codegen_flags: <defaults>
</compile_context>

<pallas_src>
import jax
import jax.numpy as jnp
import numpy as np
from jax.experimental import pallas as pl
from jax.experimental.pallas import tpu as pltpu

# ---- model hyperparameters (MyModel.__init__ with img_shape = (16, 16)) ----
IMG_H, IMG_W = 16, 16
HW = IMG_H * IMG_W                      # 256 (already lane-dense)
C_OUT = 5
K = 10
OH, OW = IMG_H - K + 1, IMG_W - K + 1   # 7, 7
D1_IN = C_OUT * OH * OW                 # 245
D1_OUT = 64
N_CLASSES = 2

# ---- lane-dense padded sizes used inside the kernel ----
FEAT_P = 256                            # conv features 245 -> 256
D1_P = 128                              # hidden 64 -> 128
NC_P = 128                              # classes 2 -> 128
NEG_BIG = -1e30                         # "-inf" bias for padded class lanes


def fused_forward_kernel(x_ref, wc_ref, bc_ref, w1_ref, b1_ref, w2_ref, b2_ref,
                         o_ref):
    """Whole forward pass for one batch tile; contractions on the MXU (bf16).

    x_ref : (TB, 256)    bf16 flattened 16x16 image (C_in = 1)
    wc_ref: (256, 256)   bf16 conv-as-matmul weights (zero cols 245..255)
    bc_ref: (1, 256)     f32 per-feature conv bias (zero-padded)
    w1_ref: (256, 128)   bf16 d1 weights (zero-padded rows/cols)
    b1_ref: (1, 128)     f32
    w2_ref: (128, 128)   bf16 d2 weights (zero-padded)
    b2_ref: (1, 128)     f32; real classes 0..1, padded lanes = -1e30
    o_ref : (TB, 128)    f32 lane-dense softmax (padded lanes == 0)
    """
    x = x_ref[...]                                             # bf16
    # Conv2d (as dense matmul, f32 accumulation) + bias + ReLU.
    feat = jnp.dot(x, wc_ref[...], preferred_element_type=jnp.float32)
    feat = jnp.maximum(feat + bc_ref[...], 0.0)                # (TB, 256) f32
    # Linear d1 + ReLU.
    h = jnp.dot(feat.astype(jnp.bfloat16), w1_ref[...],
                preferred_element_type=jnp.float32)
    h = jnp.maximum(h + b1_ref[...], 0.0)                      # (TB, 128) f32
    # Linear d2 -> lane-padded logits (padded lanes carry a -1e30 bias).
    logits = jnp.dot(h.astype(jnp.bfloat16), w2_ref[...],
                     preferred_element_type=jnp.float32)
    logits = logits + b2_ref[...]                              # (TB, 128) f32
    # Numerically stable softmax; padded lanes underflow to exactly 0.
    # reciprocal(approx) + multiply replaces the full-width divide.
    m = jnp.max(logits, axis=-1, keepdims=True)
    e = jnp.exp(logits - m)
    inv = pl.reciprocal(jnp.sum(e, axis=-1, keepdims=True), approx=True)
    o_ref[...] = e * inv                                       # lane-dense store


def _round_up(n, m):
    return (n + m - 1) // m * m


def _cdiv(a, b):
    return -(-a // b)


def prepare_params(torch_params):
    """One-time weight prep: PyTorch-layout params -> lane-dense kernel params.

    Matrices are stored in bf16 (native single-pass MXU path on v5e/v6e/v7x);
    biases stay f32.
    """
    conv_w, conv_b, d1_w, d1_b, d2_w, d2_b = [
        np.asarray(p, np.float32) for p in torch_params]
    wc = conv_w[:, 0, :, :]                                    # (C_OUT, K, K)

    # Conv -> dense matmul: W[h*16 + w, c*49 + oh*7 + ow] = wc[c, h-oh, w-ow]
    c, oh, ow, kh, kw = np.meshgrid(np.arange(C_OUT), np.arange(OH),
                                    np.arange(OW), np.arange(K), np.arange(K),
                                    indexing="ij")
    rows = ((oh + kh) * IMG_W + (ow + kw)).ravel()
    cols = (c * (OH * OW) + oh * OW + ow).ravel()
    w_conv = np.zeros((HW, FEAT_P), np.float32)
    w_conv[rows, cols] = wc[c.ravel(), kh.ravel(), kw.ravel()]

    b_conv = np.zeros((1, FEAT_P), np.float32)
    b_conv[0, :D1_IN] = np.repeat(conv_b, OH * OW)

    w1 = np.zeros((FEAT_P, D1_P), np.float32)
    w1[:D1_IN, :D1_OUT] = d1_w.T
    b1 = np.zeros((1, D1_P), np.float32)
    b1[0, :D1_OUT] = d1_b

    w2 = np.zeros((D1_P, NC_P), np.float32)
    w2[:D1_OUT, :N_CLASSES] = d2_w.T
    b2 = np.full((1, NC_P), NEG_BIG, np.float32)
    b2[0, :N_CLASSES] = d2_b

    return (jnp.asarray(w_conv, jnp.bfloat16), jnp.asarray(b_conv, jnp.float32),
            jnp.asarray(w1, jnp.bfloat16), jnp.asarray(b1, jnp.float32),
            jnp.asarray(w2, jnp.bfloat16), jnp.asarray(b2, jnp.float32))


def _choose_batch_tiling(B, max_batch_tile):
    """Even-split batch tiles: amortize step overhead, bound padding waste,
    and keep >=2 grid steps (v7x 2-TC sharding) when the batch allows."""
    n_tiles = max(_cdiv(B, max_batch_tile), 1)
    if n_tiles < 2 and B > 16:
        n_tiles = 2
    tb = _round_up(_cdiv(B, n_tiles), 16)      # 16: bf16 sublane packing
    return tb, tb * n_tiles, n_tiles


def my_model_forward(x, kernel_params, *, max_batch_tile=1024):
    """x: (B, 1, 16, 16) float32 -> (B, 2) softmax probabilities."""
    w_conv, b_conv, w1, b1, w2, b2 = kernel_params
    B = x.shape[0]
    assert x.shape[1:] == (1, IMG_H, IMG_W)

    TB, Bp, n_tiles = _choose_batch_tiling(B, max_batch_tile)

    x_flat = x.reshape(B, HW).astype(jnp.bfloat16)   # contiguous reshape + bf16
    if Bp != B:
        x_flat = jnp.pad(x_flat, ((0, Bp - B), (0, 0)))

    out = pl.pallas_call(
        fused_forward_kernel,
        out_shape=jax.ShapeDtypeStruct((Bp, NC_P), jnp.float32),
        grid_spec=pltpu.PrefetchScalarGridSpec(
            num_scalar_prefetch=0,
            grid=(n_tiles,),
            in_specs=[
                pl.BlockSpec((TB, HW), lambda i: (i, 0)),
                pl.BlockSpec((HW, FEAT_P), lambda i: (0, 0)),
                pl.BlockSpec((1, FEAT_P), lambda i: (0, 0)),
                pl.BlockSpec((FEAT_P, D1_P), lambda i: (0, 0)),
                pl.BlockSpec((1, D1_P), lambda i: (0, 0)),
                pl.BlockSpec((D1_P, NC_P), lambda i: (0, 0)),
                pl.BlockSpec((1, NC_P), lambda i: (0, 0)),
            ],
            out_specs=pl.BlockSpec((TB, NC_P), lambda i: (i, 0)),
        ),
        compiler_params=pltpu.CompilerParams(
            dimension_semantics=("parallel",)),
    )(x_flat, w_conv, b_conv, w1, b1, w2, b2)
    # Slice away batch padding and the 126 padded class lanes.
    return out[:B, :N_CLASSES]


def init_params(key):
    """Deterministic PyTorch-style uniform fan-in init, torch layouts."""
    ks = jax.random.split(key, 6)
    s_c = 1.0 / (1 * K * K) ** 0.5
    s_1 = 1.0 / D1_IN ** 0.5
    s_2 = 1.0 / D1_OUT ** 0.5
    conv_w = jax.random.uniform(ks[0], (C_OUT, 1, K, K), jnp.float32, -s_c, s_c)
    conv_b = jax.random.uniform(ks[1], (C_OUT,), jnp.float32, -s_c, s_c)
    d1_w = jax.random.uniform(ks[2], (D1_OUT, D1_IN), jnp.float32, -s_1, s_1)
    d1_b = jax.random.uniform(ks[3], (D1_OUT,), jnp.float32, -s_1, s_1)
    d2_w = jax.random.uniform(ks[4], (N_CLASSES, D1_OUT), jnp.float32, -s_2, s_2)
    d2_b = jax.random.uniform(ks[5], (N_CLASSES,), jnp.float32, -s_2, s_2)
    return conv_w, conv_b, d1_w, d1_b, d2_w, d2_b


def reference_forward(x, torch_params):
    """Pure-JAX f32 reference mirroring the PyTorch forward."""
    conv_w, conv_b, d1_w, d1_b, d2_w, d2_b = torch_params
    B = x.shape[0]
    xs = x[:, 0]
    patches = jnp.stack(
        [xs[:, kh:kh + OH, kw:kw + OW] for kh in range(K) for kw in range(K)],
        axis=-1)                                            # (B, OH, OW, K*K)
    wflat = conv_w[:, 0].reshape(C_OUT, K * K)
    conv = jnp.einsum('bhwk,ck->bchw', patches, wflat) + conv_b[None, :, None, None]
    feat = jax.nn.relu(conv).reshape(B, D1_IN)              # NCHW flatten order
    h = jax.nn.relu(feat @ d1_w.T + d1_b)
    logits = h @ d2_w.T + d2_b
    return jax.nn.softmax(logits, axis=1)


if __name__ == "__main__":
    key = jax.random.PRNGKey(0)
    k_x, k_p = jax.random.split(key)
    B = 2
    x = jax.random.normal(k_x, (B, 1, IMG_H, IMG_W), jnp.float32)  # NCHW like torch
    torch_params = init_params(k_p)
    kernel_params = prepare_params(torch_params)

    out = my_model_forward(x, kernel_params)
    out = jax.block_until_ready(out)

    ref = reference_forward(x, torch_params)
    assert out.shape == (B, N_CLASSES)
    # bf16 MXU path + approx reciprocal -> relaxed tolerance vs f32 reference.
    assert jnp.allclose(out, ref, atol=2e-2, rtol=2e-2), (out, ref)
    assert jnp.allclose(jnp.sum(out, axis=1), 1.0, atol=2e-3)

    print("KERNEL_OK")
</pallas_src>

<mosaic_0001>
module attributes {stable_mosaic.version = 11 : i64} {
  func.func @fused_forward_kernel(%arg0: i32, %arg1: memref<16x256xbf16, #tpu.memory_space<vmem>>, %arg2: memref<256x256xbf16, #tpu.memory_space<vmem>>, %arg3: memref<1x256xf32, #tpu.memory_space<vmem>>, %arg4: memref<256x128xbf16, #tpu.memory_space<vmem>>, %arg5: memref<1x128xf32, #tpu.memory_space<vmem>>, %arg6: memref<128x128xbf16, #tpu.memory_space<vmem>>, %arg7: memref<1x128xf32, #tpu.memory_space<vmem>>, %arg8: memref<16x128xf32, #tpu.memory_space<vmem>>) attributes {dimension_semantics = [#tpu.dimension_semantics<parallel>], iteration_bounds = array<i64: 1>, scalar_prefetch = 0 : i64, scratch_operands = 0 : i64, tpu.core_type = #tpu.core_type<tc>, window_params = [{transform_indices = @transform_0, window_bounds = array<i64: 16, 256>}, {pipeline_mode = #tpu.pipeline_mode<synchronous>, transform_indices = @transform_1, window_bounds = array<i64: 256, 256>}, {pipeline_mode = #tpu.pipeline_mode<synchronous>, transform_indices = @transform_2, window_bounds = array<i64: 1, 256>}, {pipeline_mode = #tpu.pipeline_mode<synchronous>, transform_indices = @transform_3, window_bounds = array<i64: 256, 128>}, {pipeline_mode = #tpu.pipeline_mode<synchronous>, transform_indices = @transform_4, window_bounds = array<i64: 1, 128>}, {pipeline_mode = #tpu.pipeline_mode<synchronous>, transform_indices = @transform_5, window_bounds = array<i64: 128, 128>}, {pipeline_mode = #tpu.pipeline_mode<synchronous>, transform_indices = @transform_6, window_bounds = array<i64: 1, 128>}, {transform_indices = @transform_7, window_bounds = array<i64: 16, 128>}]} {
    %c0 = arith.constant 0 : index
    %c0_0 = arith.constant 0 : index
    %0 = vector.load %arg1[%c0, %c0_0] : memref<16x256xbf16, #tpu.memory_space<vmem>>, vector<16x256xbf16>
    %c0_1 = arith.constant 0 : index
    %c0_2 = arith.constant 0 : index
    %1 = vector.load %arg2[%c0_1, %c0_2] : memref<256x256xbf16, #tpu.memory_space<vmem>>, vector<256x256xbf16>
    %cst = arith.constant dense<0.000000e+00> : vector<16x256xf32>
    %2 = tpu.matmul %0, %1, %cst {dimension_numbers = #tpu.dot_dimension_numbers<[1], [0], [0], [1], [0, 0, 1, 1], [], []>} : vector<16x256xbf16>, vector<256x256xbf16>, vector<16x256xf32> -> vector<16x256xf32>
    %c0_3 = arith.constant 0 : index
    %c0_4 = arith.constant 0 : index
    %3 = vector.load %arg3[%c0_3, %c0_4] : memref<1x256xf32, #tpu.memory_space<vmem>>, vector<1x256xf32>
    %4 = vector.broadcast %3 : vector<1x256xf32> to vector<16x256xf32>
    %5 = arith.addf %2, %4 : vector<16x256xf32>
    %cst_5 = arith.constant 0.000000e+00 : f32
    %6 = vector.broadcast %cst_5 : f32 to vector<16x256xf32>
    %7 = arith.maximumf %5, %6 : vector<16x256xf32>
    %8 = arith.truncf %7 : vector<16x256xf32> to vector<16x256xbf16>
    %c0_6 = arith.constant 0 : index
    %c0_7 = arith.constant 0 : index
    %9 = vector.load %arg4[%c0_6, %c0_7] : memref<256x128xbf16, #tpu.memory_space<vmem>>, vector<256x128xbf16>
    %cst_8 = arith.constant dense<0.000000e+00> : vector<16x128xf32>
    %10 = tpu.matmul %8, %9, %cst_8 {dimension_numbers = #tpu.dot_dimension_numbers<[1], [0], [0], [1], [0, 0, 1, 1], [], []>} : vector<16x256xbf16>, vector<256x128xbf16>, vector<16x128xf32> -> vector<16x128xf32>
    %c0_9 = arith.constant 0 : index
    %c0_10 = arith.constant 0 : index
    %11 = vector.load %arg5[%c0_9, %c0_10] : memref<1x128xf32, #tpu.memory_space<vmem>>, vector<1x128xf32>
    %12 = vector.broadcast %11 : vector<1x128xf32> to vector<16x128xf32>
    %13 = arith.addf %10, %12 : vector<16x128xf32>
    %cst_11 = arith.constant 0.000000e+00 : f32
    %14 = vector.broadcast %cst_11 : f32 to vector<16x128xf32>
    %15 = arith.maximumf %13, %14 : vector<16x128xf32>
    %16 = arith.truncf %15 : vector<16x128xf32> to vector<16x128xbf16>
    %c0_12 = arith.constant 0 : index
    %c0_13 = arith.constant 0 : index
    %17 = vector.load %arg6[%c0_12, %c0_13] : memref<128x128xbf16, #tpu.memory_space<vmem>>, vector<128x128xbf16>
    %cst_14 = arith.constant dense<0.000000e+00> : vector<16x128xf32>
    %18 = tpu.matmul %16, %17, %cst_14 {dimension_numbers = #tpu.dot_dimension_numbers<[1], [0], [0], [1], [0, 0, 1, 1], [], []>} : vector<16x128xbf16>, vector<128x128xbf16>, vector<16x128xf32> -> vector<16x128xf32>
    %c0_15 = arith.constant 0 : index
    %c0_16 = arith.constant 0 : index
    %19 = vector.load %arg7[%c0_15, %c0_16] : memref<1x128xf32, #tpu.memory_space<vmem>>, vector<1x128xf32>
    %20 = vector.broadcast %19 : vector<1x128xf32> to vector<16x128xf32>
    %21 = arith.addf %18, %20 : vector<16x128xf32>
    %cst_17 = arith.constant dense<0xFF800000> : vector<16xf32>
    %22 = vector.multi_reduction <maximumf>, %21, %cst_17 [1] : vector<16x128xf32> to vector<16xf32>
    %23 = vector.shape_cast %22 : vector<16xf32> to vector<16x1xf32>
    %24 = vector.broadcast %23 : vector<16x1xf32> to vector<16x128xf32>
    %25 = arith.subf %21, %24 : vector<16x128xf32>
    %26 = math.exp %25 : vector<16x128xf32>
    %cst_18 = arith.constant dense<0.000000e+00> : vector<16xf32>
    %27 = vector.multi_reduction <add>, %26, %cst_18 [1] : vector<16x128xf32> to vector<16xf32>
    %28 = vector.shape_cast %27 : vector<16xf32> to vector<16x1xf32>
    %29 = tpu.reciprocal %28 {approx = true} : vector<16x1xf32> -> vector<16x1xf32>
    %30 = vector.broadcast %29 : vector<16x1xf32> to vector<16x128xf32>
    %31 = arith.mulf %26, %30 : vector<16x128xf32>
    %c0_19 = arith.constant 0 : index
    %c0_20 = arith.constant 0 : index
    %32 = vector.load %arg8[%c0_19, %c0_20] : memref<16x128xf32, #tpu.memory_space<vmem>>, vector<16x128xf32>
    tpu.vector_store %arg8[%c0_19, %c0_20], %31 {strides = array<i32>} : memref<16x128xf32, #tpu.memory_space<vmem>>, vector<16x128xf32>,
    return
  }
  func.func @transform_0(%arg0: i32) -> (i32, i32) {
    %c0_i32 = arith.constant 0 : i32
    %c0_i32_0 = arith.constant 0 : i32
    return %arg0, %c0_i32 : i32, i32
  }
  func.func @transform_1(%arg0: i32) -> (i32, i32) {
    %c0_i32 = arith.constant 0 : i32
    %c0_i32_0 = arith.constant 0 : i32
    %c0_i32_1 = arith.constant 0 : i32
    return %c0_i32, %c0_i32_0 : i32, i32
  }
  func.func @transform_2(%arg0: i32) -> (i32, i32) {
    %c0_i32 = arith.constant 0 : i32
    %c0_i32_0 = arith.constant 0 : i32
    %c0_i32_1 = arith.constant 0 : i32
    return %c0_i32, %c0_i32_0 : i32, i32
  }
  func.func @transform_3(%arg0: i32) -> (i32, i32) {
    %c0_i32 = arith.constant 0 : i32
    %c0_i32_0 = arith.constant 0 : i32
    %c0_i32_1 = arith.constant 0 : i32
    return %c0_i32, %c0_i32_0 : i32, i32
  }
  func.func @transform_4(%arg0: i32) -> (i32, i32) {
    %c0_i32 = arith.constant 0 : i32
    %c0_i32_0 = arith.constant 0 : i32
    %c0_i32_1 = arith.constant 0 : i32
    return %c0_i32, %c0_i32_0 : i32, i32
  }
  func.func @transform_5(%arg0: i32) -> (i32, i32) {
    %c0_i32 = arith.constant 0 : i32
    %c0_i32_0 = arith.constant 0 : i32
    %c0_i32_1 = arith.constant 0 : i32
    return %c0_i32, %c0_i32_0 : i32, i32
  }
  func.func @transform_6(%arg0: i32) -> (i32, i32) {
    %c0_i32 = arith.constant 0 : i32
    %c0_i32_0 = arith.constant 0 : i32
    %c0_i32_1 = arith.constant 0 : i32
    return %c0_i32, %c0_i32_0 : i32, i32
  }
  func.func @transform_7(%arg0: i32) -> (i32, i32) {
    %c0_i32 = arith.constant 0 : i32
    %c0_i32_0 = arith.constant 0 : i32
    return %arg0, %c0_i32 : i32, i32
  }
}

</mosaic_0001>

<bundles_post_ra>
// kernel: tpu_custom_call.1
= control target key start
LH: loop header
LB: loop body
LE: loop exit
PB: predicated region body
PF: predicated region fallthrough
CT: control target
= control target key end

     0   :  { %12 = vsyncpa [#allocation3], 0  ;;  %s1137_s0 = inlined_call_operand.hbm [shape: bf16[16,256], index: 0, kind: input, shape index: {}]   ;;  %s1138_s1 = inlined_call_operand.hbm [shape: bf16[256,256], index: 1, kind: input, shape index: {}]   ;;  %s1139_s2 = inlined_call_operand.vmem [shape: f32[1,256], index: 2, kind: input, shape index: {}]   ;;  %s1140_s3 = inlined_call_operand.hbm [shape: bf16[256,128], index: 3, kind: input, shape index: {}]   ;;  %s1141_s4 = inlined_call_operand.vmem [shape: f32[1,128], index: 4, kind: input, shape index: {}]   ;;  %s1142_s5 = inlined_call_operand.hbm [shape: bf16[128,128], index: 5, kind: input, shape index: {}]   ;;  %s1143_s6 = inlined_call_operand.vmem [shape: f32[1,128], index: 6, kind: input, shape index: {}]   ;;  %s1144_s7 = inlined_call_operand.hbm [shape: f32[16,128], index: 7, kind: output, shape index: {}]  }
   0x1   :  { %13 = vsyncpa [#allocation6], 0 }
   0x2   :  { %14 = vsyncpa [#allocation9], 0 }
   0x3   :  { %15 = vsyncpa [#allocation4], 0  ;;  %s1001_s24 = smov [#allocation5]   ;;  %s1002_s26 = smov [#allocation2]  }
   0x4   :  { %s33_s25 = sshll.u32 %s1001_s24, 4  ;;  %s21_s27 = sshll.u32 %s1002_s26, 4  ;;  %s34_s25 = int_to_ptr.vmem [resolvable:$true] %s33_s25  ;;  %s1052_s27 = int_to_ptr.vmem [resolvable:$true] %s21_s27 }
   0x5   :  { %s883_s30 = scalar_lea.hbm %s1138_s1, 4096 }
   0x6   :  { %p884_p0 = scmp.ne.s32.totalorder %s1138_s1, %s883_s30  ;;  %p887_p1 = scmp.lt.u32.totalorder %s883_s30, %s1138_s1 }
   0x8   :  { %p889_p2 = pnand %p887_p1, %p884_p0 }
   0xa   :  { %892 = shalt.err (!%p889_p2)
}
   0xb   :  { %s893_s12 = scalar_lea.vmem %s34_s25, 4096  ;;  %p898_p4 = scmp.lt.s32.totalorder %s34_s25, %s34_s25 }
   0xc   :  { %p894_p3 = scmp.ne.s32.totalorder %s34_s25, %s893_s12  ;;  %p899_p5 = scmp.lt.s32.totalorder %s893_s12, %s893_s12 }
   0xe   :  { %p900_p6 = por %p899_p5, %p898_p4 }
  0x10   :  { %p901_p7 = pnand %p900_p6, %p894_p3 }
  0x12   :  { %904 = shalt.err (!%p901_p7)
}
  0x13   :  { %s1003_s13 = smov 128   ;;  %s1004_s14 = smov 8  }
  0x14   :  { %39 = dma.hbm_to_vmem [thread:$0]  %s1138_s1, 4096, %s34_s25, [#allocation6], %s1003_s13, %s1003_s13, %s1004_s14  }
  0x15   :  { %s905_s19 = scalar_lea.hbm %s1137_s0, 256 }
  0x16   :  { %p906_p8 = scmp.ne.s32.totalorder %s1137_s0, %s905_s19  ;;  %p909_p9 = scmp.lt.u32.totalorder %s905_s19, %s1137_s0 }
  0x18   :  { %p911_p10 = pnand %p909_p9, %p906_p8 }
  0x1a   :  { %914 = shalt.err (!%p911_p10)
}
  0x1b   :  { %s915_s24 = scalar_lea.vmem %s1052_s27, 256  ;;  %p920_p12 = scmp.lt.s32.totalorder %s1052_s27, %s1052_s27 }
  0x1c   :  { %p916_p11 = scmp.ne.s32.totalorder %s1052_s27, %s915_s24  ;;  %p921_p13 = scmp.lt.s32.totalorder %s915_s24, %s915_s24 }
  0x1e   :  { %p922_p0 = por %p921_p13, %p920_p12 }
  0x20   :  { %p923_p1 = pnand %p922_p0, %p916_p11 }
  0x22   :  { %926 = shalt.err (!%p923_p1)
}
  0x23   :  { %27 = dma.hbm_to_vmem [thread:$0]  %s1137_s0, 256, %s1052_s27, [#allocation3], %s1003_s13, %s1003_s13, %s1004_s14  }
  0x24   :  { %s1005_s26 = smov [#allocation7]   ;;  %s927_s8 = scalar_lea.hbm %s1140_s3, 2048 }
  0x25   :  { %s47_s28 = sshll.u32 %s1005_s26, 4  ;;  %p928_p2 = scmp.ne.s32.totalorder %s1140_s3, %s927_s8  ;;  %s48_s28 = int_to_ptr.vmem [resolvable:$true] %s47_s28 }
  0x26   :  { %p931_p3 = scmp.lt.u32.totalorder %s927_s8, %s1140_s3 }
  0x28   :  { %p933_p4 = pnand %p931_p3, %p928_p2 }
  0x2a   :  { %936 = shalt.err (!%p933_p4)
}
  0x2b   :  { %s937_s15 = scalar_lea.vmem %s48_s28, 2048  ;;  %p942_p6 = scmp.lt.s32.totalorder %s48_s28, %s48_s28 }
  0x2c   :  { %p938_p5 = scmp.ne.s32.totalorder %s48_s28, %s937_s15  ;;  %p943_p7 = scmp.lt.s32.totalorder %s937_s15, %s937_s15 }
  0x2e   :  { %p944_p8 = por %p943_p7, %p942_p6 }
  0x30   :  { %p945_p9 = pnand %p944_p8, %p938_p5 }
  0x32   :  { %948 = shalt.err (!%p945_p9)
}
  0x33   :  { %s1006_s0 = smov 64   ;;  %s1007_s27 = smov 4  }
  0x34   :  { %53 = dma.hbm_to_vmem [thread:$0]  %s1140_s3, 2048, %s48_s28, [#allocation6], %s1006_s0, %s1006_s0, %s1007_s27  }
  0x35   :  { %s1008_s18 = smov [#allocation8]   ;;  %s949_s22 = scalar_lea.hbm %s1142_s5, 1024 }
  0x36   :  { %s61_s19 = sshll.u32 %s1008_s18, 4  ;;  %p950_p10 = scmp.ne.s32.totalorder %s1142_s5, %s949_s22  ;;  %s62_s19 = int_to_ptr.vmem [resolvable:$true] %s61_s19 }
  0x37   :  { %p953_p11 = scmp.lt.u32.totalorder %s949_s22, %s1142_s5 }
  0x39   :  { %p955_p12 = pnand %p953_p11, %p950_p10 }
  0x3b   :  { %958 = shalt.err (!%p955_p12)
}
  0x3c   :  { %s959_s26 = scalar_lea.vmem %s62_s19, 1024  ;;  %p964_p0 = scmp.lt.s32.totalorder %s62_s19, %s62_s19 }
  0x3d   :  { %p960_p13 = scmp.ne.s32.totalorder %s62_s19, %s959_s26  ;;  %p965_p1 = scmp.lt.s32.totalorder %s959_s26, %s959_s26 }
  0x3f   :  { %p966_p2 = por %p965_p1, %p964_p0 }
  0x41   :  { %p967_p3 = pnand %p966_p2, %p960_p13 }
  0x43   :  { %970 = shalt.err (!%p967_p3)
}
  0x44   :  { %67 = dma.hbm_to_vmem [thread:$0]  %s1142_s5, 1024, %s62_s19, [#allocation9], %s1006_s0, %s1006_s0, %s1007_s27  }
  0x45   :  { %993 = dma.done.wait [#allocation3], 256  }
  0x46   :  { %994 = vsyncadd [#allocation3], 4294967040 }
  0x47   :  { %995 = dma.done.wait [#allocation6], 6144  }
  0x48   :  { %996 = vsyncadd [#allocation6], 4294961152 }
  0x49   :  { %997 = dma.done.wait [#allocation9], 1024  }
  0x4a   :  { %998 = vsyncadd [#allocation9], 4294966272  ;;  %v800_v0 = vld [vmem:[#allocation5 + $0x4] ss:$8 sps:$4 sm:$0xff]   ;;  %v802_v1 = vld [vmem:[#allocation5] ss:$8 sps:$4 sm:$0xff]   ;;  %v119_v51 = vlaneseq }
  0x4b   :  { %299 = vmatprep.subr.bf16.mxu0 %v800_v0  ;;  %v803_v2 = vld [vmem:[#allocation5 + $0x14] ss:$8 sps:$4 sm:$0xff]   ;;  %v805_v3 = vld [vmem:[#allocation5 + $0x10] ss:$8 sps:$4 sm:$0xff]   ;;  %v806_v4 = vld [vmem:[#allocation5 + $0x24] ss:$8 sps:$4 sm:$0xff]  }
  0x4c   :  { %300 = vmatpush1.bf16.msra.mxu0 %v802_v1  ;;  %v808_v5 = vld [vmem:[#allocation5 + $0x20] ss:$8 sps:$4 sm:$0xff]   ;;  %v809_v6 = vld [vmem:[#allocation5 + $0x34] ss:$8 sps:$4 sm:$0xff]   ;;  %v811_v7 = vld [vmem:[#allocation5 + $0x30] ss:$8 sps:$4 sm:$0xff]  }
  0x4d   :  { %301 = vmatprep.subr.bf16.mxu0 %v803_v2  ;;  %v812_v8 = vld [vmem:[#allocation5 + $0x44] ss:$8 sps:$4 sm:$0xff]   ;;  %v814_v9 = vld [vmem:[#allocation5 + $0x40] ss:$8 sps:$4 sm:$0xff]   ;;  %v815_v10 = vld [vmem:[#allocation5 + $0x54] ss:$8 sps:$4 sm:$0xff]  }
  0x4e   :  { %v817_v11 = vld [vmem:[#allocation5 + $0x50] ss:$8 sps:$4 sm:$0xff]   ;;  %v818_v12 = vld [vmem:[#allocation5 + $0x64] ss:$8 sps:$4 sm:$0xff]   ;;  %v820_v13 = vld [vmem:[#allocation5 + $0x60] ss:$8 sps:$4 sm:$0xff]  }
  0x4f   :  { %v821_v14 = vld [vmem:[#allocation5 + $0x74] ss:$8 sps:$4 sm:$0xff]   ;;  %v851_v16 = vld [vmem:[#allocation7 + $0x40] sm:$0xff]   ;;  %v823_v18 = vld [vmem:[#allocation5 + $0x70] ss:$8 sps:$4 sm:$0xff]   ;;  %v1009_v50 = vmov 0.0  }
  0x50   :  { %302 = vmatpush1.bf16.msra.mxu0 %v805_v3  ;;  %v850_v15 = vld [vmem:[#allocation2 + $0x4] ss:$8 sps:$4 sm:$0xff]   ;;  %v852_v17 = vld [vmem:[#allocation7] sm:$0xff]   ;;  %738 = vmatprep.subr.bf16.mxu1 %v851_v16  ;;  %v853_v19 = vld [vmem:[#allocation7 + $0x48] sm:$0xff]   ;;  %v120_v52 = vshrl.u32 %v119_v51, 7  ;;  %vm1010_vm0 = vmmov 0  }
  0x51   :  { %303 = vmatprep.subr.bf16.mxu0 %v806_v4  ;;  %331 = vmatprep.mubr.bf16.mxu0 %v850_v15  ;;  %v854_v20 = vld [vmem:[#allocation7 + $0x8] sm:$0xff]   ;;  %v855_v21 = vld [vmem:[#allocation7 + $0x50] sm:$0xff]   ;;  %v857_v25 = vld [vmem:[#allocation7 + $0x58] sm:$0xff]  }
  0x52   :  { %739 = vmatpush3.bf16.msra.mxu1 %v852_v17  ;;  %v824_v22 = vld [vmem:[#allocation5 + $0x84] ss:$8 sps:$4 sm:$0xff]   ;;  %v826_v23 = vld [vmem:[#allocation5 + $0x80] ss:$8 sps:$4 sm:$0xff]   ;;  %v856_v24 = vld [vmem:[#allocation7 + $0x10] sm:$0xff]   ;;  %v121_v53 = vsub.s32 0, %v120_v52 }
  0x53   :  { %740 = vmatprep.subr.bf16.mxu1 %v853_v19  ;;  %v827_v26 = vld [vmem:[#allocation5 + $0x94] ss:$8 sps:$4 sm:$0xff]   ;;  %v829_v27 = vld [vmem:[#allocation5 + $0x90] ss:$8 sps:$4 sm:$0xff]   ;;  %v859_v29 = vld [vmem:[#allocation7 + $0x60] sm:$0xff]   ;;  %v125_v55 = vsub.s32 1, %v120_v52 }
  0x54   :  { %304 = vmatpush1.bf16.msra.mxu0 %v808_v5  ;;  %v858_v28 = vld [vmem:[#allocation7 + $0x18] sm:$0xff]   ;;  %v830_v30 = vld [vmem:[#allocation5 + $0xa4] ss:$8 sps:$4 sm:$0xff]   ;;  %v832_v32 = vld [vmem:[#allocation5 + $0xa0] ss:$8 sps:$4 sm:$0xff]  }
  0x55   :  { %305 = vmatprep.subr.bf16.mxu0 %v809_v6  ;;  %v860_v31 = vld [vmem:[#allocation7 + $0x20] sm:$0xff]   ;;  %v861_v33 = vld [vmem:[#allocation7 + $0x68] sm:$0xff]   ;;  %v833_v34 = vld [vmem:[#allocation5 + $0xb4] ss:$8 sps:$4 sm:$0xff]  }
  0x56   :  { %741 = vmatpush3.bf16.msra.mxu1 %v854_v20  ;;  %v835_v35 = vld [vmem:[#allocation5 + $0xb0] ss:$8 sps:$4 sm:$0xff]   ;;  %v836_v36 = vld [vmem:[#allocation5 + $0xc4] ss:$8 sps:$4 sm:$0xff]   ;;  %v838_v37 = vld [vmem:[#allocation5 + $0xc0] ss:$8 sps:$4 sm:$0xff]  }
  0x57   :  { %742 = vmatprep.subr.bf16.mxu1 %v855_v21  ;;  %v839_v38 = vld [vmem:[#allocation5 + $0xd4] ss:$8 sps:$4 sm:$0xff]   ;;  %v841_v39 = vld [vmem:[#allocation5 + $0xd0] ss:$8 sps:$4 sm:$0xff]   ;;  %v842_v40 = vld [vmem:[#allocation5 + $0xe4] ss:$8 sps:$4 sm:$0xff]  }
  0x58   :  { %306 = vmatpush1.bf16.msra.mxu0 %v811_v7  ;;  %v844_v41 = vld [vmem:[#allocation5 + $0xe0] ss:$8 sps:$4 sm:$0xff]   ;;  %v845_v42 = vld [vmem:[#allocation5 + $0xf4] ss:$8 sps:$4 sm:$0xff]   ;;  %v847_v43 = vld [vmem:[#allocation5 + $0xf0] ss:$8 sps:$4 sm:$0xff]  }
  0x59   :  { %307 = vmatprep.subr.bf16.mxu0 %v812_v8  ;;  %v848_v44 = vld [vmem:[#allocation2] ss:$8 sps:$4 sm:$0xff]   ;;  %v862_v45 = vld [vmem:[#allocation7 + $0x28] sm:$0xff]   ;;  %v867_v8 = vld [vmem:[#allocation8] sm:$0xff]  }
  0x5a   :  { %743 = vmatpush3.bf16.msra.mxu1 %v856_v24  ;;  %v863_v46 = vld [vmem:[#allocation7 + $0x70] sm:$0xff]   ;;  %v865_v48 = vld [vmem:[#allocation7 + $0x78] sm:$0xff]  }
  0x5b   :  { %744 = vmatprep.subr.bf16.mxu1 %v857_v25  ;;  %v864_v47 = vld [vmem:[#allocation7 + $0x30] sm:$0xff]   ;;  %v866_v49 = vld [vmem:[#allocation7 + $0x38] sm:$0xff]  }
  0x5c   :  { %308 = vmatpush1.bf16.msra.mxu0 %v814_v9  ;;  %v117_v54 = vld [vmem:[%s1139_s2] sm:$0x3]  ;;  %v868_v9 = vld [vmem:[#allocation8 + $0x8] sm:$0xff]   ;;  %v874_v15 = vld [vmem:[#allocation8 + $0x38] sm:$0xff]  }
  0x5d   :  { %309 = vmatprep.subr.bf16.mxu0 %v815_v10  ;;  %v122_v56 = vrot.slane %v117_v54, %v121_v53  ;;  %v126_v57 = vrot.slane %v117_v54, %v125_v55  ;;  %v869_v10 = vld [vmem:[#allocation8 + $0x10] sm:$0xff]  }
  0x5e   :  { %745 = vmatpush3.bf16.msra.mxu1 %v858_v28  ;;  %v712_v17 = vld [vmem:[%s1141_s4] ss:$0 sm:$0xff]  ;;  %s1011_s4 = smov [#allocation10]  }
  0x5f   :  { %746 = vmatprep.subr.bf16.mxu1 %v859_v29  ;;  %v729_v28 = vld [vmem:[%s1143_s6] ss:$0 sm:$0xff]  ;;  %s664_s6 = sshll.u32 %s1011_s4, 4  ;;  %s665_s6 = int_to_ptr.vmem [resolvable:$true] %s664_s6 }
  0x60   :  { %310 = vmatpush1.bf16.msra.mxu0 %v817_v11  ;;  %v870_v11 = vld [vmem:[#allocation8 + $0x18] sm:$0xff]   ;;  %s971_s10 = scalar_lea.vmem %s665_s6, 256  ;;  %p976_p5 = scmp.lt.s32.totalorder %s665_s6, %s665_s6 }
  0x61   :  { %311 = vmatprep.subr.bf16.mxu0 %v818_v12  ;;  %v871_v12 = vld [vmem:[#allocation8 + $0x20] sm:$0xff]   ;;  %p972_p4 = scmp.ne.s32.totalorder %s665_s6, %s971_s10  ;;  %p977_p6 = scmp.lt.s32.totalorder %s971_s10, %s971_s10 }
  0x62   :  { %747 = vmatpush3.bf16.msra.mxu1 %v860_v31 }
  0x63   :  { %748 = vmatprep.subr.bf16.mxu1 %v861_v33  ;;  %p978_p7 = por %p977_p6, %p976_p5 }
  0x64   :  { %312 = vmatpush1.bf16.msra.mxu0 %v820_v13  ;;  %v872_v13 = vld [vmem:[#allocation8 + $0x28] sm:$0xff]  }
  0x65   :  { %313 = vmatprep.subr.bf16.mxu0 %v821_v14  ;;  %v873_v14 = vld [vmem:[#allocation8 + $0x30] sm:$0xff]   ;;  %p979_p8 = pnand %p978_p7, %p972_p4 }
  0x66   :  { %749 = vmatpush3.bf16.msra.mxu1 %v862_v45 }
  0x67   :  { %750 = vmatprep.subr.bf16.mxu1 %v863_v46 }
  0x68   :  { %314 = vmatpush1.bf16.msra.mxu0 %v823_v18 }
  0x69   :  { %315 = vmatprep.subr.bf16.mxu0 %v824_v22 }
  0x6a   :  { %751 = vmatpush3.bf16.msra.mxu1 %v864_v47 }
  0x6b   :  { %752 = vmatprep.subr.bf16.mxu1 %v865_v48 }
  0x6c   :  { %316 = vmatpush1.bf16.msra.mxu0 %v826_v23 }
  0x6d   :  { %317 = vmatprep.subr.bf16.mxu0 %v827_v26 }
  0x6e   :  { %753 = vmatpush3.bf16.msra.mxu1 %v866_v49 }
  0x6f   :  { %769 = vmatprep.subr.bf16.mxu1 %v1009_v50 }
  0x70   :  { %318 = vmatpush1.bf16.msra.mxu0 %v829_v27 }
  0x71   :  { %319 = vmatprep.subr.bf16.mxu0 %v830_v30 }
  0x74   :  { %320 = vmatpush1.bf16.msra.mxu0 %v832_v32 }
  0x75   :  { %321 = vmatprep.subr.bf16.mxu0 %v833_v34 }
  0x78   :  { %322 = vmatpush1.bf16.msra.mxu0 %v835_v35 }
  0x79   :  { %323 = vmatprep.subr.bf16.mxu0 %v836_v36 }
  0x7c   :  { %324 = vmatpush1.bf16.msra.mxu0 %v838_v37 }
  0x7d   :  { %325 = vmatprep.subr.bf16.mxu0 %v839_v38 }
  0x80   :  { %326 = vmatpush1.bf16.msra.mxu0 %v841_v39 }
  0x81   :  { %327 = vmatprep.subr.bf16.mxu0 %v842_v40 }
  0x84   :  { %328 = vmatpush1.bf16.msra.mxu0 %v844_v41 }
  0x85   :  { %329 = vmatprep.subr.bf16.mxu0 %v845_v42 }
  0x88   :  { %330 = vmatpush1.bf16.msra.mxu0 %v847_v43 }
  0x8b   :  { %332 = vmatmul.mubr.bf16.vlgmr.msra.gmra.mrb[0].mxu0 %v848_v44 }
 0x15e   :  { %v333_v58 = vpop.f32.mrb[0].mxu0 }
 0x15f   :  { %v334_v59 = vadd.f32 %v333_v58, %v122_v56  ;;  %v335_v60 = vpop.f32.mrb[1].mxu0 }
 0x160   :  { %v336_v61 = vadd.f32 %v335_v60, %v126_v57  ;;  %v337_v62 = vpop.f32.mrb[2].mxu0 }
 0x161   :  { %v338_v63 = vadd.f32 %v337_v62, %v122_v56  ;;  %v339_v0 = vpop.f32.mrb[3].mxu0  ;;  %v342_v2 = vmax.f32 %v334_v59, 0.0 }
 0x162   :  { %v340_v1 = vadd.f32 %v339_v0, %v126_v57  ;;  %v343_v4 = vmax.f32 %v336_v61, 0.0 }
 0x163   :  { %v344_v3 = vmax.f32 %v338_v63, 0.0 }
 0x164   :  { %v345_v5 = vmax.f32 %v340_v1, 0.0 }
 0x165   :  { %v346_v6 = vpack.c.bf16 %v344_v3, %v342_v2 }
 0x166   :  { %v347_v7 = vpack.c.bf16 %v345_v5, %v343_v4 }
 0x168   :  { %515 = vmatprep.mubr.bf16.mxu1 %v347_v7 }
 0x169   :  { %516 = vmatmul.mubr.bf16.vlgmr.msra.gmra.mrb[0].mxu1 %v346_v6 }
 0x16a   :  { %770 = vmatpush3.bf16.msra.mxu1 %v867_v8  ;;  %785 = vmatprep.mubr.msk.bf16.mxu1 %vm1010_vm0, %v1009_v50 }
 0x16b   :  { %771 = vmatprep.subr.bf16.mxu1 %v1009_v50 }
 0x16e   :  { %772 = vmatpush3.bf16.msra.mxu1 %v868_v9 }
 0x16f   :  { %773 = vmatprep.subr.bf16.mxu1 %v1009_v50 }
 0x172   :  { %774 = vmatpush3.bf16.msra.mxu1 %v869_v10 }
 0x173   :  { %775 = vmatprep.subr.bf16.mxu1 %v1009_v50 }
 0x176   :  { %776 = vmatpush3.bf16.msra.mxu1 %v870_v11 }
 0x177   :  { %777 = vmatprep.subr.bf16.mxu1 %v1009_v50 }
 0x17a   :  { %778 = vmatpush3.bf16.msra.mxu1 %v871_v12 }
 0x17b   :  { %779 = vmatprep.subr.bf16.mxu1 %v1009_v50 }
 0x17e   :  { %780 = vmatpush3.bf16.msra.mxu1 %v872_v13 }
 0x17f   :  { %781 = vmatprep.subr.bf16.mxu1 %v1009_v50 }
 0x182   :  { %782 = vmatpush3.bf16.msra.mxu1 %v873_v14 }
 0x183   :  { %783 = vmatprep.subr.bf16.mxu1 %v1009_v50 }
 0x186   :  { %784 = vmatpush3.bf16.msra.mxu1 %v874_v15 }
 0x23c   :  { %v754_v16 = vpop.f32.mrb[0].mxu1 }
 0x23d   :  { %v755_v18 = vpop.f32.mrb[1].mxu1 }
 0x23e   :  { %v756_v19 = vadd.f32 %v755_v18, %v754_v16  ;;  %v757_v20 = vpop.f32.mrb[2].mxu1 }
 0x23f   :  { %v758_v21 = vpop.f32.mrb[3].mxu1 }
 0x240   :  { %v518_v22 = vadd.f32 %v756_v19, %v712_v17  ;;  %v759_v23 = vadd.f32 %v758_v21, %v757_v20 }
 0x242   :  { %v521_v24 = vadd.f32 %v759_v23, %v712_v17  ;;  %v524_v25 = vmax.f32 %v518_v22, 0.0 }
 0x244   :  { %v525_v26 = vmax.f32 %v521_v24, 0.0 }
 0x246   :  { %v526_v27 = vpack.c.bf16 %v525_v26, %v524_v25 }
 0x248   :  { %786 = vmatmul.mubr.bf16.vlgmr.msra.gmra.mrb[4].mxu1 %v526_v27 }
 0x31b   :  { %v632_v29 = vpop.f32.mrb[4].mxu1 }
 0x31c   :  { %v633_v30 = vadd.f32 %v729_v28, %v632_v29  ;;  %v787_v31 = vpop.f32.mrb[5].mxu1 }
 0x31d   :  { %v635_v32 = vpop.f32.mrb[6].mxu1 }
 0x31e   :  { %639 = vmax.xlane.f32.xlu0 %v633_v30  ;;  %v788_v33 = vpop.f32.mrb[7].mxu1  ;;  %v636_v34 = vadd.f32 %v729_v28, %v635_v32 }
 0x322   :  { %641 = vmax.xlane.f32.xlu0 %v636_v34 }
 0x3ab   :  { %v640_v35 = vpop.xlane.xlu0 %639 }
 0x3ac   :  { %v643_v36 = vsub.f32 %v633_v30, %v640_v35 }
 0x3ae   :  { %v645_v37 = vmul.f32 1.442695, %v643_v36 }
 0x3af   :  { %v642_v38 = vpop.xlane.xlu0 %641 }
 0x3b0   :  { %875 = vpow2.f32 %v645_v37  ;;  %v644_v39 = vsub.f32 %v636_v34, %v642_v38 }
 0x3b2   :  { %v647_v40 = vmul.f32 1.442695, %v644_v39 }
 0x3b4   :  { %877 = vpow2.f32 %v647_v40 }
 0x3ba   :  { %v876_v41 = vpop.eup %875 }
 0x3bb   :  { %649 = vadd.xlane.f32.xlu1 %v876_v41 }
 0x3be   :  { %v878_v42 = vpop.eup %877 }
 0x3bf   :  { %651 = vadd.xlane.f32.xlu1 %v878_v42 }
 0x448   :  { %v650_v43 = vpop.xlane.xlu1 %649 }
 0x449   :  { %879 = vrcp.f32 %v650_v43 }
 0x44c   :  { %v652_v44 = vpop.xlane.xlu1 %651 }
 0x44d   :  { %881 = vrcp.f32 %v652_v44 }
 0x453   :  { %v880_v45 = vpop.eup %879 }
 0x454   :  { %v655_v46 = vmul.f32 %v880_v45, %v876_v41 }
 0x456   :  { %657 = vst [vmem:[#allocation10] sm:$0xff] %v655_v46 }
 0x457   :  { %v882_v47 = vpop.eup %881 }
 0x458   :  { %v656_v48 = vmul.f32 %v882_v47, %v878_v42 }
 0x45a   :  { %658 = vst [vmem:[#allocation10 + $0x8] sm:$0xff] %v656_v48 }
 0x45b   :  { %982 = shalt.err (!%p979_p8)
}
 0x45c   :  { %s983_s15 = scalar_lea.hbm %s1144_s7, 256 }
 0x45d   :  { %p984_p9 = scmp.ne.s32.totalorder %s1144_s7, %s983_s15  ;;  %p987_p10 = scmp.lt.u32.totalorder %s983_s15, %s1144_s7 }
 0x45f   :  { %p989_p11 = pnand %p987_p10, %p984_p9 }
 0x461   :  { %992 = shalt.err (!%p989_p11)
}
 0x462   :  { %670 = dma.vmem_to_hbm [thread:$0]  %s665_s6, 256, %s1144_s7, [#allocation4], %s1003_s13, %s1003_s13, %s1004_s14  }
 0x463   :  { %999 = dma.done.wait [#allocation4], 256  }
 0x464   :  { %1000 = vsyncadd [#allocation4], 4294967040 }
 0x465   :  { %674 = vsyncpa [#allocation3], 1 }
 0x466   :  { %675 = vsyncpa [#allocation6], 1 }
 0x467   :  { %676 = vsyncpa [#allocation9], 1 }
 0x468   :  { %677 = vsyncpa [#allocation4], 1 }

</bundles_post_ra>
